<compile_context>
chip_gen: v7x
topology: tpu7x:2x2x1
jax: 0.10.0
libtpu: 0.0.40
codegen_flags: <defaults>
</compile_context>

<pallas_src>
import functools

import jax
import jax.numpy as jnp
from jax.experimental import pallas as pl
from jax.experimental.pallas import tpu as pltpu

LANE = 128        # lane width (last dim)
ROW_ALIGN = 16    # row-tile alignment (covers bf16 sublane packing)


def _round_up(x, m):
    return ((x + m - 1) // m) * m


def _pad2d(a, rows, cols):
    r, c = a.shape
    return jnp.pad(a, ((0, rows - r), (0, cols - c)))


# ---------------------------------------------------------------------------
# Pallas kernel: fused encoder -> (decoder || generator) MLP chain, one row tile
# ---------------------------------------------------------------------------
def _ssg_forward_kernel(
    x_ref,                      # (TILE_N, D)        f32   (un-padded feature dim)
    we1_ref, be1_ref,           # (D, Hp)  bf16,  (1, Hp) f32
    wc_ref, bc_ref,             # (Hp, Lp+2Hp) bf16, (1, Lp+2Hp) f32   [we2 || we2@wdg1]
    wdg2_ref, bdg2_ref,         # (2Hp, Dp) bf16, (1, Dp) f32          [wd2 ; wg2]
    code_ref,                   # (TILE_N, Lp)  bf16
    recon_ref,                  # (TILE_N, Dp)  bf16
    *,
    latent_pad,                 # static: Lp (split point of the concatenated matmul)
):
    x = x_ref[...].astype(jnp.bfloat16)

    # ---- encoder layer 1: Linear -> ReLU ----
    h = jnp.dot(x, we1_ref[...], preferred_element_type=jnp.float32) + be1_ref[...]
    h = jnp.maximum(h, 0.0).astype(jnp.bfloat16)

    # ---- encoder layer 2 folded into decoder/generator layer 1 ----
    #   ch[:, :Lp]  = code                        (= h @ we2 + be2)
    #   ch[:, Lp:]  = pre-ReLU dec/gen hidden     (= code @ [wd1||wg1] + [bd1||bg1])
    ch = jnp.dot(h, wc_ref[...], preferred_element_type=jnp.float32) + bc_ref[...]
    code = ch[:, :latent_pad]
    hdg = jnp.maximum(ch[:, latent_pad:], 0.0).astype(jnp.bfloat16)
    code_ref[...] = code.astype(code_ref.dtype)

    # ---- decoder layer 2 + generator layer 2 (recon = dec + gen) ----
    recon = jnp.dot(hdg, wdg2_ref[...], preferred_element_type=jnp.float32) + bdg2_ref[...]
    recon_ref[...] = recon.astype(recon_ref.dtype)


# ---------------------------------------------------------------------------
# Host-side (one-time) weight preparation: lane-pad, fuse dec/gen, fold we2 in
# ---------------------------------------------------------------------------
def prepare_fused_params(params, compute_dtype=jnp.bfloat16):
    D, H = params["we1"].shape
    L = params["we2"].shape[1]
    Dp, Hp, Lp = _round_up(D, LANE), _round_up(H, LANE), _round_up(L, LANE)

    # encoder layer 1 (K dim stays un-padded: x is read at its true width D)
    we1 = _pad2d(params["we1"], D, Hp).astype(compute_dtype)
    be1 = _pad2d(params["be1"], 1, Hp).astype(jnp.float32)

    # encoder layer 2 + [decoder || generator] layer 1, all in f32 first
    we2 = _pad2d(params["we2"], Hp, Lp)
    be2 = _pad2d(params["be2"], 1, Lp)
    wdg1 = jnp.concatenate(
        [_pad2d(params["wd1"], Lp, Hp), _pad2d(params["wg1"], Lp, Hp)], axis=1)   # (Lp, 2Hp)
    bdg1 = jnp.concatenate(
        [_pad2d(params["bd1"], 1, Hp), _pad2d(params["bg1"], 1, Hp)], axis=1)     # (1, 2Hp)

    # Fold encoder layer 2 into dec/gen layer 1 (exact linear-linear composition, f32).
    wf = we2 @ wdg1                     # (Hp, 2Hp)
    bf = be2 @ wdg1 + bdg1              # (1, 2Hp)
    wc = jnp.concatenate([we2, wf], axis=1).astype(compute_dtype)    # (Hp, Lp+2Hp)
    bc = jnp.concatenate([be2, bf], axis=1).astype(jnp.float32)      # (1, Lp+2Hp)

    # [decoder ; generator] layer 2; recon = dec + gen -> biases summed.
    wdg2 = jnp.concatenate(
        [_pad2d(params["wd2"], Hp, Dp), _pad2d(params["wg2"], Hp, Dp)], axis=0
    ).astype(compute_dtype)                                          # (2Hp, Dp)
    bdg2 = (_pad2d(params["bd2"], 1, Dp) + _pad2d(params["bg2"], 1, Dp)).astype(jnp.float32)

    fused = dict(we1=we1, be1=be1, wc=wc, bc=bc, wdg2=wdg2, bdg2=bdg2)
    dims = dict(D=D, H=H, L=L, Dp=Dp, Hp=Hp, Lp=Lp)
    return fused, dims


def _choose_tile_n(n_rows, max_tile=2048, min_grid_steps=4):
    """Row tile: sublane-aligned, <= max_tile, and >= min_grid_steps grid steps when possible."""
    t = _round_up(max(1, -(-n_rows // min_grid_steps)), ROW_ALIGN)
    return max(ROW_ALIGN, min(max_tile, t))


def _vmem_estimate_bytes(tile_n, D, Hp, Lp, Dp):
    wc_cols = Lp + 2 * Hp
    w_bytes = (D * Hp + Hp * wc_cols + 2 * Hp * Dp) * 2 + (Hp + wc_cols + Dp) * 4
    io_bytes = tile_n * (D * 4 + Lp * 2 + Dp * 2)
    interm_bytes = tile_n * (Hp + wc_cols + Dp) * 4
    # weights + row tiles are double-buffered by the pipeline; intermediates live once.
    return 2 * (w_bytes + io_bytes) + interm_bytes


# ---------------------------------------------------------------------------
# Wrapper: row-tiled grid, VMEM-resident weights
# ---------------------------------------------------------------------------
def seq_star_gan_forward(tx, fused_params, dims, max_tile_n=2048):
    """tx: (T, B, D) float32. Returns (code (T, B, L), recon (T, B, D)) in float32."""
    T, B, D = tx.shape
    assert D == dims["D"]
    Dp, Hp, Lp, L = dims["Dp"], dims["Hp"], dims["Lp"], dims["L"]
    N = T * B

    tile_n = _choose_tile_n(N, max_tile_n)
    Np = _round_up(N, tile_n)
    grid = (Np // tile_n,)

    # Un-padded feature dim, f32 straight from the caller; only row-pad so the grid
    # divides evenly (padded rows compute garbage that is sliced away below).
    x2d = tx.reshape(N, D)
    if Np != N:
        x2d = jnp.pad(x2d, ((0, Np - N), (0, 0)))

    p = fused_params
    weights = (p["we1"], p["be1"], p["wc"], p["bc"], p["wdg2"], p["bdg2"])

    def full_block(a):
        return pl.BlockSpec(a.shape, lambda i: (0, 0))

    in_specs = [pl.BlockSpec((tile_n, D), lambda i: (i, 0))] + [full_block(w) for w in weights]
    out_specs = (
        pl.BlockSpec((tile_n, Lp), lambda i: (i, 0)),
        pl.BlockSpec((tile_n, Dp), lambda i: (i, 0)),
    )

    flops = 2 * Np * (D * Hp + Hp * (Lp + 2 * Hp) + 2 * Hp * Dp)
    bytes_accessed = (
        Np * D * 4
        + sum(int(w.size) * w.dtype.itemsize for w in weights)
        + Np * Lp * 2 + Np * Dp * 2
    )
    cost = pl.CostEstimate(flops=flops, transcendentals=0, bytes_accessed=bytes_accessed)

    vmem_limit = int(min(32 << 20, max(8 << 20, 2 * _vmem_estimate_bytes(tile_n, D, Hp, Lp, Dp))))

    kernel = functools.partial(_ssg_forward_kernel, latent_pad=Lp)

    code2d, recon2d = pl.pallas_call(
        kernel,
        out_shape=(
            jax.ShapeDtypeStruct((Np, Lp), jnp.bfloat16),
            jax.ShapeDtypeStruct((Np, Dp), jnp.bfloat16),
        ),
        grid=grid,
        in_specs=in_specs,
        out_specs=out_specs,
        compiler_params=pltpu.CompilerParams(
            dimension_semantics=("parallel",),   # rows independent -> v7x megacore shard
            vmem_limit_bytes=vmem_limit,
        ),
        cost_estimate=cost,
    )(x2d, *weights)

    # Slice back to true widths + f32 for interface parity with the PyTorch module.
    code = code2d[:N, :L].astype(jnp.float32).reshape(T, B, L)
    recon = recon2d[:N, :D].astype(jnp.float32).reshape(T, B, D)
    return code, recon


# ---------------------------------------------------------------------------
# Deterministic parameter construction (mimics nn.Linear's U(-1/sqrt(fan_in), .) init)
# Weights stored (in_features, out_features), biases (1, out_features).
# ---------------------------------------------------------------------------
def _linear_params(key, fan_in, fan_out):
    kw, kb = jax.random.split(key)
    bound = 1.0 / jnp.sqrt(jnp.asarray(fan_in, jnp.float32))
    w = jax.random.uniform(kw, (fan_in, fan_out), jnp.float32, -bound, bound)
    b = jax.random.uniform(kb, (1, fan_out), jnp.float32, -bound, bound)
    return w, b


def make_params(key, d_in, hidden, latent):
    keys = jax.random.split(key, 6)
    we1, be1 = _linear_params(keys[0], d_in, hidden)    # encoder[vi] layer 1
    we2, be2 = _linear_params(keys[1], hidden, latent)  # encoder[vi] layer 2
    wd1, bd1 = _linear_params(keys[2], latent, hidden)  # decoder[vo] layer 1
    wd2, bd2 = _linear_params(keys[3], hidden, d_in)    # decoder[vo] layer 2
    wg1, bg1 = _linear_params(keys[4], latent, hidden)  # generator[vo] layer 1
    wg2, bg2 = _linear_params(keys[5], hidden, d_in)    # generator[vo] layer 2
    return dict(we1=we1, be1=be1, we2=we2, be2=be2,
                wd1=wd1, bd1=bd1, wd2=wd2, bd2=bd2,
                wg1=wg1, bg1=bg1, wg2=wg2, bg2=bg2)


# Pure-JAX references.
def _ref_forward(tx, p):
    """Exact f32 (PyTorch-equivalent) math."""
    def lin(x, w, b):
        return jnp.dot(x, w, preferred_element_type=jnp.float32) + b
    h = jnp.maximum(lin(tx, p["we1"], p["be1"]), 0.0)
    code = lin(h, p["we2"], p["be2"])
    hd = jnp.maximum(lin(code, p["wd1"], p["bd1"]), 0.0)
    dec = lin(hd, p["wd2"], p["bd2"])
    hg = jnp.maximum(lin(code, p["wg1"], p["bg1"]), 0.0)
    gen = lin(hg, p["wg2"], p["bg2"])
    return code, dec + gen


def _ref_fused(tx, fp, dims):
    """Mirror of the kernel's fused bf16-operand / f32-accumulate math."""
    T, B, D = tx.shape
    Lp, L = dims["Lp"], dims["L"]
    x = tx.reshape(T * B, D).astype(jnp.bfloat16)
    h = jnp.dot(x, fp["we1"], preferred_element_type=jnp.float32) + fp["be1"]
    h = jnp.maximum(h, 0.0).astype(jnp.bfloat16)
    ch = jnp.dot(h, fp["wc"], preferred_element_type=jnp.float32) + fp["bc"]
    code = ch[:, :Lp].astype(jnp.bfloat16)
    hdg = jnp.maximum(ch[:, Lp:], 0.0).astype(jnp.bfloat16)
    recon = jnp.dot(hdg, fp["wdg2"], preferred_element_type=jnp.float32) + fp["bdg2"]
    recon = recon.astype(jnp.bfloat16)
    code = code[:, :L].astype(jnp.float32).reshape(T, B, L)
    recon = recon[:, :D].astype(jnp.float32).reshape(T, B, D)
    return code, recon


if __name__ == "__main__":
    # Small shapes consistent with the module's seq-first (T, B, D) convention.
    T, B, D = 16, 4, 16      # seq len, batch, per-view feature dim  (N = 64 -> 4 row tiles)
    HIDDEN, LATENT = 32, 8   # MLP hidden width, latent-code dim
    # n_views = 3; forward(tx, vi=0, vo=1) -> params correspond to
    # encoder[0], decoder[1], generator[1]  (use_gen_dis=True).

    key = jax.random.PRNGKey(0)
    k_x, k_p = jax.random.split(key)
    tx = jax.random.normal(k_x, (T, B, D), dtype=jnp.float32)
    params = make_params(k_p, D, HIDDEN, LATENT)

    # One-time host-side padding / decoder+generator fusion / encoder-layer-2 folding.
    fused_params, dims = prepare_fused_params(params)

    code, recon = seq_star_gan_forward(tx, fused_params, dims)
    code, recon = jax.block_until_ready((code, recon))

    assert code.shape == (T, B, LATENT) and recon.shape == (T, B, D)

    # Tight check against a reference that mirrors the kernel's fused bf16/f32 math.
    code_f, recon_f = _ref_fused(tx, fused_params, dims)
    assert jnp.allclose(code, code_f, atol=1e-2, rtol=1e-2)
    assert jnp.allclose(recon, recon_f, atol=1e-2, rtol=1e-2)

    # Looser sanity check against the exact f32 (PyTorch-equivalent) math.
    code_f32, recon_f32 = _ref_forward(tx, params)
    assert jnp.allclose(code, code_f32, atol=0.1, rtol=0.1)
    assert jnp.allclose(recon, recon_f32, atol=0.1, rtol=0.1)

    # TODO(synk): training-side pieces (SSGTrainingScheduler, Adam optimizers, L1/CE losses,
    # softmax heads of LatentClassifier / ViewDiscriminator) are not part of forward() and
    # are not kernelized.
    print("KERNEL_OK")
</pallas_src>

<mosaic_0001>
module attributes {stable_mosaic.version = 11 : i64} {
  func.func @_ssg_forward_kernel(%arg0: i32, %arg1: memref<16x16xf32, #tpu.memory_space<vmem>>, %arg2: memref<16x128xbf16, #tpu.memory_space<vmem>>, %arg3: memref<1x128xf32, #tpu.memory_space<vmem>>, %arg4: memref<128x384xbf16, #tpu.memory_space<vmem>>, %arg5: memref<1x384xf32, #tpu.memory_space<vmem>>, %arg6: memref<256x128xbf16, #tpu.memory_space<vmem>>, %arg7: memref<1x128xf32, #tpu.memory_space<vmem>>, %arg8: memref<16x128xbf16, #tpu.memory_space<vmem>>, %arg9: memref<16x128xbf16, #tpu.memory_space<vmem>>) attributes {dimension_semantics = [#tpu.dimension_semantics<parallel>], iteration_bounds = array<i64: 4>, scalar_prefetch = 0 : i64, scratch_operands = 0 : i64, tpu.core_type = #tpu.core_type<tc>, window_params = [{transform_indices = @transform_0, window_bounds = array<i64: 16, 16>}, {pipeline_mode = #tpu.pipeline_mode<synchronous>, transform_indices = @transform_1, window_bounds = array<i64: 16, 128>}, {pipeline_mode = #tpu.pipeline_mode<synchronous>, transform_indices = @transform_2, window_bounds = array<i64: 1, 128>}, {pipeline_mode = #tpu.pipeline_mode<synchronous>, transform_indices = @transform_3, window_bounds = array<i64: 128, 384>}, {pipeline_mode = #tpu.pipeline_mode<synchronous>, transform_indices = @transform_4, window_bounds = array<i64: 1, 384>}, {pipeline_mode = #tpu.pipeline_mode<synchronous>, transform_indices = @transform_5, window_bounds = array<i64: 256, 128>}, {pipeline_mode = #tpu.pipeline_mode<synchronous>, transform_indices = @transform_6, window_bounds = array<i64: 1, 128>}, {transform_indices = @transform_7, window_bounds = array<i64: 16, 128>}, {transform_indices = @transform_8, window_bounds = array<i64: 16, 128>}]} {
    %c0 = arith.constant 0 : index
    %c0_0 = arith.constant 0 : index
    %0 = vector.load %arg1[%c0, %c0_0] : memref<16x16xf32, #tpu.memory_space<vmem>>, vector<16x16xf32>
    %1 = arith.truncf %0 : vector<16x16xf32> to vector<16x16xbf16>
    %c0_1 = arith.constant 0 : index
    %c0_2 = arith.constant 0 : index
    %2 = vector.load %arg2[%c0_1, %c0_2] : memref<16x128xbf16, #tpu.memory_space<vmem>>, vector<16x128xbf16>
    %cst = arith.constant dense<0.000000e+00> : vector<16x128xf32>
    %3 = tpu.matmul %1, %2, %cst {dimension_numbers = #tpu.dot_dimension_numbers<[1], [0], [0], [1], [0, 0, 1, 1], [], []>} : vector<16x16xbf16>, vector<16x128xbf16>, vector<16x128xf32> -> vector<16x128xf32>
    %c0_3 = arith.constant 0 : index
    %c0_4 = arith.constant 0 : index
    %4 = vector.load %arg3[%c0_3, %c0_4] : memref<1x128xf32, #tpu.memory_space<vmem>>, vector<1x128xf32>
    %5 = vector.broadcast %4 : vector<1x128xf32> to vector<16x128xf32>
    %6 = arith.addf %3, %5 : vector<16x128xf32>
    %cst_5 = arith.constant 0.000000e+00 : f32
    %7 = vector.broadcast %cst_5 : f32 to vector<16x128xf32>
    %8 = arith.maximumf %6, %7 : vector<16x128xf32>
    %9 = arith.truncf %8 : vector<16x128xf32> to vector<16x128xbf16>
    %c0_6 = arith.constant 0 : index
    %c0_7 = arith.constant 0 : index
    %10 = vector.load %arg4[%c0_6, %c0_7] : memref<128x384xbf16, #tpu.memory_space<vmem>>, vector<128x384xbf16>
    %cst_8 = arith.constant dense<0.000000e+00> : vector<16x384xf32>
    %11 = tpu.matmul %9, %10, %cst_8 {dimension_numbers = #tpu.dot_dimension_numbers<[1], [0], [0], [1], [0, 0, 1, 1], [], []>} : vector<16x128xbf16>, vector<128x384xbf16>, vector<16x384xf32> -> vector<16x384xf32>
    %c0_9 = arith.constant 0 : index
    %c0_10 = arith.constant 0 : index
    %12 = vector.load %arg5[%c0_9, %c0_10] : memref<1x384xf32, #tpu.memory_space<vmem>>, vector<1x384xf32>
    %13 = vector.broadcast %12 : vector<1x384xf32> to vector<16x384xf32>
    %14 = arith.addf %11, %13 : vector<16x384xf32>
    %15 = vector.extract_strided_slice %14 {offsets = [0, 0], sizes = [16, 128], strides = [1, 1]} : vector<16x384xf32> to vector<16x128xf32>
    %16 = vector.extract_strided_slice %14 {offsets = [0, 128], sizes = [16, 256], strides = [1, 1]} : vector<16x384xf32> to vector<16x256xf32>
    %cst_11 = arith.constant 0.000000e+00 : f32
    %17 = vector.broadcast %cst_11 : f32 to vector<16x256xf32>
    %18 = arith.maximumf %16, %17 : vector<16x256xf32>
    %19 = arith.truncf %18 : vector<16x256xf32> to vector<16x256xbf16>
    %20 = arith.truncf %15 : vector<16x128xf32> to vector<16x128xbf16>
    %c0_12 = arith.constant 0 : index
    %c0_13 = arith.constant 0 : index
    %21 = vector.load %arg8[%c0_12, %c0_13] : memref<16x128xbf16, #tpu.memory_space<vmem>>, vector<16x128xbf16>
    tpu.vector_store %arg8[%c0_12, %c0_13], %20 {strides = array<i32>} : memref<16x128xbf16, #tpu.memory_space<vmem>>, vector<16x128xbf16>,
    %c0_14 = arith.constant 0 : index
    %c0_15 = arith.constant 0 : index
    %22 = vector.load %arg6[%c0_14, %c0_15] : memref<256x128xbf16, #tpu.memory_space<vmem>>, vector<256x128xbf16>
    %cst_16 = arith.constant dense<0.000000e+00> : vector<16x128xf32>
    %23 = tpu.matmul %19, %22, %cst_16 {dimension_numbers = #tpu.dot_dimension_numbers<[1], [0], [0], [1], [0, 0, 1, 1], [], []>} : vector<16x256xbf16>, vector<256x128xbf16>, vector<16x128xf32> -> vector<16x128xf32>
    %c0_17 = arith.constant 0 : index
    %c0_18 = arith.constant 0 : index
    %24 = vector.load %arg7[%c0_17, %c0_18] : memref<1x128xf32, #tpu.memory_space<vmem>>, vector<1x128xf32>
    %25 = vector.broadcast %24 : vector<1x128xf32> to vector<16x128xf32>
    %26 = arith.addf %23, %25 : vector<16x128xf32>
    %27 = arith.truncf %26 : vector<16x128xf32> to vector<16x128xbf16>
    %c0_19 = arith.constant 0 : index
    %c0_20 = arith.constant 0 : index
    %28 = vector.load %arg9[%c0_19, %c0_20] : memref<16x128xbf16, #tpu.memory_space<vmem>>, vector<16x128xbf16>
    tpu.vector_store %arg9[%c0_19, %c0_20], %27 {strides = array<i32>} : memref<16x128xbf16, #tpu.memory_space<vmem>>, vector<16x128xbf16>,
    return
  }
  func.func @transform_0(%arg0: i32) -> (i32, i32) {
    %c0_i32 = arith.constant 0 : i32
    %c0_i32_0 = arith.constant 0 : i32
    return %arg0, %c0_i32 : i32, i32
  }
  func.func @transform_1(%arg0: i32) -> (i32, i32) {
    %c0_i32 = arith.constant 0 : i32
    %c0_i32_0 = arith.constant 0 : i32
    %c0_i32_1 = arith.constant 0 : i32
    return %c0_i32, %c0_i32_0 : i32, i32
  }
  func.func @transform_2(%arg0: i32) -> (i32, i32) {
    %c0_i32 = arith.constant 0 : i32
    %c0_i32_0 = arith.constant 0 : i32
    %c0_i32_1 = arith.constant 0 : i32
    return %c0_i32, %c0_i32_0 : i32, i32
  }
  func.func @transform_3(%arg0: i32) -> (i32, i32) {
    %c0_i32 = arith.constant 0 : i32
    %c0_i32_0 = arith.constant 0 : i32
    %c0_i32_1 = arith.constant 0 : i32
    return %c0_i32, %c0_i32_0 : i32, i32
  }
  func.func @transform_4(%arg0: i32) -> (i32, i32) {
    %c0_i32 = arith.constant 0 : i32
    %c0_i32_0 = arith.constant 0 : i32
    %c0_i32_1 = arith.constant 0 : i32
    return %c0_i32, %c0_i32_0 : i32, i32
  }
  func.func @transform_5(%arg0: i32) -> (i32, i32) {
    %c0_i32 = arith.constant 0 : i32
    %c0_i32_0 = arith.constant 0 : i32
    %c0_i32_1 = arith.constant 0 : i32
    return %c0_i32, %c0_i32_0 : i32, i32
  }
  func.func @transform_6(%arg0: i32) -> (i32, i32) {
    %c0_i32 = arith.constant 0 : i32
    %c0_i32_0 = arith.constant 0 : i32
    %c0_i32_1 = arith.constant 0 : i32
    return %c0_i32, %c0_i32_0 : i32, i32
  }
  func.func @transform_7(%arg0: i32) -> (i32, i32) {
    %c0_i32 = arith.constant 0 : i32
    %c0_i32_0 = arith.constant 0 : i32
    return %arg0, %c0_i32 : i32, i32
  }
  func.func @transform_8(%arg0: i32) -> (i32, i32) {
    %c0_i32 = arith.constant 0 : i32
    %c0_i32_0 = arith.constant 0 : i32
    return %arg0, %c0_i32 : i32, i32
  }
}

</mosaic_0001>

<bundles_post_ra>
// kernel: tpu_custom_call.1
= control target key start
LH: loop header
LB: loop body
LE: loop exit
PB: predicated region body
PF: predicated region fallthrough
CT: control target
= control target key end

     0   :  { %14 = vsyncpa [#allocation3], 0  ;;  %s1761_s0 = inlined_call_operand.vmem [shape: f32[64,16], index: 0, kind: input, shape index: {}]   ;;  %s1762_s1 = inlined_call_operand.vmem [shape: bf16[16,128], index: 1, kind: input, shape index: {}]   ;;  %s1763_s2 = inlined_call_operand.vmem [shape: f32[1,128], index: 2, kind: input, shape index: {}]   ;;  %s1764_s3 = inlined_call_operand.hbm [shape: bf16[128,384], index: 3, kind: input, shape index: {}]   ;;  %s1765_s4 = inlined_call_operand.vmem [shape: f32[1,384], index: 4, kind: input, shape index: {}]   ;;  %s1766_s5 = inlined_call_operand.hbm [shape: bf16[256,128], index: 5, kind: input, shape index: {}]   ;;  %s1767_s6 = inlined_call_operand.vmem [shape: f32[1,128], index: 6, kind: input, shape index: {}]   ;;  %s1768_s7 = inlined_call_operand.hbm [shape: bf16[64,128], index: 7, kind: output, shape index: {0}]   ;;  %s1769_s8 = inlined_call_operand.hbm [shape: bf16[64,128], index: 8, kind: output, shape index: {1}]  }
   0x1   :  { %15 = vsyncpa [#allocation6], 0 }
   0x2   :  { %16 = vsyncpa [#allocation4], 0 }
   0x3   :  { %18 = vsyncpa [#allocation4 + $0x1], 0 }
   0x4   :  { %19 = vsyncpa [#allocation9], 0 }
   0x5   :  { %21 = vsyncpa [#allocation9 + $0x1], 0  ;;  %s1514_s27 = smov 0   ;;  %s1516_s28 = smov 0  }
   0x6   :  { %s1518_s29 = smov 0   ;;  %s1520_s30 = smov 0  }
   0x7 LB: > { %1774 = sst [smem:[#allocation14_spill]] %s1450_s29  ;;  %s1535_s9 = sadd.s32 4294967295, %s1454_s30   ;;  %s1454_s30 = sphi %s1520_s30, %s1792_s30   ;;  %s1450_s29 = sphi %s1518_s29, %s1791_s29   ;;  %s1446_s28 = sphi %s1516_s28, %s1790_s28   ;;  %s1442_s27 = sphi %s1514_s27, %s1789_s27  }
   0x8   : > { %s1030_s10 = sadd.s32 4294967294, %s1454_s30   ;;  %s1539_s11 = sadd.s32 1, %s1454_s30  }
   0x9   : > { %s186_s12 = sadd.s32 1, %s1450_s29  ;;  %s183_s13 = ssub.s32 %s1454_s30, %s1539_s11 }
   0xa   : > { %p196_p0 = scmp.ne.s32.totalorder %s1450_s29, %s1446_s28  ;;  %p184_p1 = scmp.eq.s32.totalorder %s183_s13, 0 }
   0xb   : > { %p197_p2 = scmp.eq.s32.totalorder %s1535_s9, 3  ;;  %p202_p3 = scmp.ne.s32.totalorder %s1446_s28, %s1442_s27 }
   0xc   : > { %p203_p4 = scmp.eq.s32.totalorder %s1030_s10, 3  ;;  %p1031_p7 = scmp.ge.s32.totalorder %s1454_s30, 1 }
   0xd   : > { %s1550_s14 = scalar_select %p184_p1, %s1450_s29, %s186_s12  }
   0xe   : > { %p1552_p5 = por %p197_p2, %p196_p0  ;;  %p1556_p6 = por %p203_p4, %p202_p3 }
   0xf   : > { %1775 = sst [smem:[#allocation15_spill]] %s1550_s14  ;;  %p236_p8 = scmp.lt.s32.totalorder %s1454_s30, 5 }
  0x10   : > { %s1776_s15 = scalar_select %p1552_p5, 1, 0 }
  0x11   : > { %s1777_s16 = scalar_select %p1556_p6, 1, 0 }
  0x12   : > { %p1770_p9 = scmp.eq.s32.totalorder %s1535_s9, 0  ;;  %p1563_p10 = pnand %p1031_p7, %p236_p8 }
  0x13   : > { %s1456_s18 = smov [#allocation2]   ;;  %s1457_s21 = smov [#allocation5]  }
  0x14   : > { %s1778_s17 = scalar_select %p1563_p10, 1, 0 }
  0x15   : > { %s254_s19 = sshll.u32 %s1456_s18, 4  ;;  %p1185_p11 = pneg %p1563_p10  ;;  %s255_s19 = int_to_ptr.vmem [resolvable:$true] %s254_s19 }
  0x16   : > { %s270_s22 = sshll.u32 %s1457_s21, 4  ;;  %s1296_s25 = scalar_lea.hbm %s1764_s3, 3072  ;;  %s1575_s22 = int_to_ptr.vmem [resolvable:$true] %s270_s22 }
  0x17   : > { %p1571_p12 = pnand %p1770_p9, %p1185_p11  ;;  %p1297_p13 = scmp.ne.s32.totalorder %s1764_s3, %s1296_s25 }
  0x18   : > { %p1303_p3 = scmp.lt.u32.totalorder %s1296_s25, %s1764_s3 }
  0x19   : > { %p1298_p0 = pneg %p1571_p12 }
  0x1b   : > { %p1299_p1 = pnand %p1298_p0, %p1297_p13 }
  0x1d   : > { %p1300_p2 = pneg %p1299_p1 }
  0x1f   : > { %p1305_p4 = pnand %p1303_p3, %p1300_p2 }
  0x21   : > { %1308 = shalt.err (!%p1305_p4)
}
  0x22   : > { %s1309_s18 = scalar_lea.vmem %s255_s19, 3072  ;;  %p1317_p9 = scmp.lt.s32.totalorder %s255_s19, %s255_s19 }
  0x23   : > { %p1310_p7 = scmp.ne.s32.totalorder %s255_s19, %s1309_s18  ;;  %p1318_p6 = scmp.lt.s32.totalorder %s1309_s18, %s1309_s18 }
  0x25   : > { %p1312_p8 = pnand %p1310_p7, %p1298_p0  ;;  %p1319_p5 = por %p1318_p6, %p1317_p9 }
  0x27   : > { %p1313_p11 = pneg %p1312_p8 }
  0x29   : > { %p1320_p10 = pnand %p1319_p5, %p1313_p11 }
  0x2b   : > { %1323 = shalt.err (!%p1320_p10)
}
  0x2c   : > { %s1458_s21 = smov 192   ;;  %s1459_s23 = smov 12  }
  0x2d   : > { %1188 = dma.hbm_to_vmem [thread:$0]  (!%p1571_p12), %s1764_s3, 3072, %s255_s19, [#allocation3], %s1458_s21, %s1458_s21, %s1459_s23  }
  0x2e   : > { %s1324_s12 = scalar_lea.hbm %s1766_s5, 2048 }
  0x2f   : > { %p1325_p13 = scmp.ne.s32.totalorder %s1766_s5, %s1324_s12  ;;  %p1331_p9 = scmp.lt.u32.totalorder %s1324_s12, %s1766_s5 }
  0x31   : > { %p1327_p5 = pnand %p1325_p13, %p1298_p0 }
  0x33   : > { %p1328_p6 = pneg %p1327_p5 }
  0x35   : > { %p1333_p10 = pnand %p1331_p9, %p1328_p6 }
  0x37   : > { %1336 = shalt.err (!%p1333_p10)
}
  0x38   : > { %s1337_s19 = scalar_lea.vmem %s1575_s22, 2048  ;;  %p1345_p4 = scmp.lt.s32.totalorder %s1575_s22, %s1575_s22 }
  0x39   : > { %p1338_p1 = scmp.ne.s32.totalorder %s1575_s22, %s1337_s19  ;;  %p1346_p7 = scmp.lt.s32.totalorder %s1337_s19, %s1337_s19 }
  0x3b   : > { %p1340_p2 = pnand %p1338_p1, %p1298_p0  ;;  %p1347_p8 = por %p1346_p7, %p1345_p4 }
  0x3d   : > { %p1341_p3 = pneg %p1340_p2 }
  0x3f   : > { %p1348_p11 = pnand %p1347_p8, %p1341_p3 }
  0x41   : > { %1351 = shalt.err (!%p1348_p11)
}
  0x42   : > { %s1460_s29 = smov 64   ;;  %s1461_s14 = smov 4  }
  0x43   : > { %1191 = dma.hbm_to_vmem [thread:$0]  (!%p1571_p12), %s1766_s5, 2048, %s1575_s22, [#allocation6], %s1460_s29, %s1460_s29, %s1461_s14  }
  0x44   : > { %p1780_p13 = scmp.ne.s32.totalorder %s1778_s17, 0 }
  0x45   : > { %p1781_p0 = scmp.eq.s32.totalorder (!%p1780_p13), %s1535_s9, 0 }
  0x46   : > { %298 = sbr.rel (%p1780_p13) target bundleno = 766 (0x2fe), region = 48 }
  0x4d   : > { %1425 = dma.done.wait (%p1781_p0), [#allocation3], 3072   ;;  %p1782_p5 = pmov %p1781_p0 }
  0x4e   : > { %p1783_p6 = pmov %p1781_p0 }
  0x4f   : > { %1427 = vsyncadd (%p1782_p5), [#allocation3], 4294964224 }
  0x50   : > { %1429 = dma.done.wait (%p1783_p6), [#allocation6], 2048   ;;  %p1784_p9 = pmov %p1781_p0 }
  0x51   : > { %s1040_s20 = sshll.u32 %s1535_s9, 1  ;;  %v1462_v0 = vmov 0.0   ;;  %vm1463_vm0 = vmmov 0   ;;  %v1247_v1 = vld [vmem:[%s1762_s1] sm:$0xff]   ;;  %vm368_vm1 = vcmask 130048   ;;  %v1464_v29 = vmov 0  }
  0x52   : > { %1431 = vsyncadd (%p1784_p9), [#allocation6], 4294965248  ;;  %1147 = vmatprep.subr.bf16.mxu0 %v1462_v0  ;;  %1149 = vmatprep.mubr.msk.bf16.mxu0 %vm1463_vm0, %v1462_v0  ;;  %p342_p12 = scmp.lt.s32.totalorder %s1040_s20, 7  ;;  %v1248_v5 = vld [vmem:[#allocation2 + $0x4] ss:$12 sps:$4 sm:$0xff]   ;;  %v1282_v42 = vld [vmem:[#allocation5 + $0x48] sm:$0xff]   ;;  %v450_v56 = vlaneseq }
  0x53   : > { %1148 = vmatpush3.bf16.msra.mxu0 %v1247_v1  ;;  %v1250_v6 = vld [vmem:[#allocation2] ss:$12 sps:$4 sm:$0xff]   ;;  %v1251_v7 = vld [vmem:[#allocation2 + $0x8] ss:$12 sps:$4 sm:$0xff]   ;;  %593 = vmatprep.subr.bf16.mxu1 %v1248_v5  ;;  %v1254_v9 = vld [vmem:[#allocation2 + $0x18] ss:$12 sps:$4 sm:$0xff]  }
  0x54   : > { %s1794_s20 = smov (!%p342_p12, %s1040_s20), 7  ;;  %1153 = vmatprep.subr.bf16.mxu0 %v1462_v0  ;;  %v1252_v8 = vld [vmem:[#allocation2 + $0x1c] ss:$12 sps:$4 sm:$0xff]   ;;  %594 = vmatpush1.bf16.msra.mxu1 %v1250_v6  ;;  %v1255_v10 = vld [vmem:[#allocation2 + $0x20] ss:$12 sps:$4 sm:$0xff]   ;;  %v1284_v44 = vld [vmem:[#allocation5 + $0x50] sm:$0xff]  }
  0x55   : > { %s1041_s17 = sshll.u32 %s1794_s20, 3  ;;  %595 = vmatprep.subr.bf16.mxu1 %v1252_v8  ;;  %v1256_v11 = vld [vmem:[#allocation2 + $0x34] ss:$12 sps:$4 sm:$0xff]   ;;  %v1258_v12 = vld [vmem:[#allocation2 + $0x30] ss:$12 sps:$4 sm:$0xff]   ;;  %625 = vmatprep.mubr.bf16.mxu1 %v1464_v29  ;;  %v1283_v43 = vld [vmem:[#allocation5 + $0x8] sm:$0xff]  }
  0x56   : > { %s345_s25 = scalar_lea.vmem %s1761_s0, %s1041_s17  ;;  %v1259_v13 = vld [vmem:[#allocation2 + $0x38] ss:$12 sps:$4 sm:$0xff]   ;;  %v1262_v15 = vld [vmem:[#allocation2 + $0x48] ss:$12 sps:$4 sm:$0xff]   ;;  %v1263_v16 = vld [vmem:[#allocation2 + $0x50] ss:$12 sps:$4 sm:$0xff]  }
  0x57   : > { %v350_v2 = vld [vmem:[%s345_s25] sm:$0xff]  ;;  %v351_v3 = vld [vmem:[%s345_s25 + $0x8] sm:$0xff]  ;;  %v1274_v24 = vld [vmem:[#allocation2 + $0x90] ss:$12 sps:$4 sm:$0xff]   ;;  %v451_v57 = vshrl.u32 %v450_v56, 7  ;;  %s1661_s29 = sand.u32 1, %s1446_s28  }
  0x58   : > { %v352_v4 = vpack.c.bf16 %v351_v3, %v350_v2  ;;  %596 = vmatpush1.bf16.msra.mxu1 %v1254_v9  ;;  %v1260_v14 = vld [vmem:[#allocation2 + $0x4c] ss:$12 sps:$4 sm:$0xff]   ;;  %v1264_v17 = vld [vmem:[#allocation2 + $0x64] ss:$12 sps:$4 sm:$0xff]   ;;  %v1267_v19 = vld [vmem:[#allocation2 + $0x68] ss:$12 sps:$4 sm:$0xff]  }
  0x59   : > { %597 = vmatprep.subr.bf16.mxu1 %v1256_v11  ;;  %v1266_v18 = vld [vmem:[#allocation2 + $0x60] ss:$12 sps:$4 sm:$0xff]   ;;  %v1268_v20 = vld [vmem:[#allocation2 + $0x7c] ss:$12 sps:$4 sm:$0xff]   ;;  %v1270_v21 = vld [vmem:[#allocation2 + $0x78] ss:$12 sps:$4 sm:$0xff]  }
  0x5a   : > { %1150 = vmatmul.mubr.msk.bf16.vlgmr.msra.gmra.mrb[0].mxu0 %vm368_vm1, %v352_v4  ;;  %v1271_v22 = vld [vmem:[#allocation2 + $0x80] ss:$12 sps:$4 sm:$0xff]   ;;  %v1275_v25 = vld [vmem:[#allocation2 + $0x98] ss:$12 sps:$4 sm:$0xff]   ;;  %v1278_v27 = vld [vmem:[#allocation2 + $0xa8] ss:$12 sps:$4 sm:$0xff]  }
  0x5b   : > { %1154 = vmatpush3.bf16.msra.mxu0 %v1251_v7  ;;  %1169 = vmatprep.mubr.msk.bf16.mxu0 %vm1463_vm0, %v1462_v0  ;;  %v1272_v23 = vld [vmem:[#allocation2 + $0x94] ss:$12 sps:$4 sm:$0xff]   ;;  %v1276_v26 = vld [vmem:[#allocation2 + $0xac] ss:$12 sps:$4 sm:$0xff]   ;;  %v1279_v28 = vld [vmem:[#allocation2 + $0xb0] ss:$12 sps:$4 sm:$0xff]  }
  0x5c   : > { %1155 = vmatprep.subr.bf16.mxu0 %v1462_v0  ;;  %598 = vmatpush1.bf16.msra.mxu1 %v1258_v12  ;;  %v1280_v30 = vld [vmem:[#allocation5 + $0x40] sm:$0xff]   ;;  %v1285_v45 = vld [vmem:[#allocation5 + $0x10] sm:$0xff]   ;;  %v1286_v46 = vld [vmem:[#allocation5 + $0x58] sm:$0xff]   ;;  %v460_v58 = vsub.s32 2, %v451_v57  ;;  %v456_v60 = vsub.s32 1, %v451_v57  ;;  %v452_v61 = vsub.s32 0, %v451_v57 }
  0x5d   : > { %599 = vmatprep.subr.bf16.mxu1 %v1260_v14  ;;  %v1042_v31 = vld [vmem:[%s1763_s2] ss:$0 sm:$0xff]  ;;  %v1287_v47 = vld [vmem:[#allocation5 + $0x18] sm:$0xff]   ;;  %v1290_v50 = vld [vmem:[#allocation5 + $0x68] sm:$0xff]   ;;  %s1038_s14 = sshll.u32 %s1661_s29, 3  ;;  %s1102_s20 = sshll.u32 %s1535_s9, 7 }
  0x5e   : > { %v1281_v40 = vld [vmem:[#allocation5] sm:$0xff]   ;;  %v1291_v51 = vld [vmem:[#allocation5 + $0x28] sm:$0xff]   ;;  %v1292_v52 = vld [vmem:[#allocation5 + $0x70] sm:$0xff]   ;;  %s333_s21 = scalar_lea.vmem [#allocation7], %s1038_s14  ;;  %s1674_s24 = scalar_lea.hbm %s1768_s7, %s1102_s20 }
  0x5f   : > { %1156 = vmatpush3.bf16.msra.mxu0 %v1255_v10  ;;  %v1288_v48 = vld [vmem:[#allocation5 + $0x60] sm:$0xff]   ;;  %v1293_v53 = vld [vmem:[#allocation5 + $0x30] sm:$0xff]   ;;  %v1294_v54 = vld [vmem:[#allocation5 + $0x78] sm:$0xff]   ;;  %s898_s23 = sshll.u32 %s333_s21, 4  ;;  %s880_s25 = scalar_lea.sflag [#allocation4], %s1661_s29  ;;  %s1666_s23 = int_to_ptr.vmem [resolvable:$true] %s898_s23 }
  0x60   : > { %1157 = vmatprep.subr.bf16.mxu0 %v1462_v0  ;;  %600 = vmatpush1.bf16.msra.mxu1 %v1262_v15  ;;  %v1289_v49 = vld [vmem:[#allocation5 + $0x20] sm:$0xff]   ;;  %v1295_v55 = vld [vmem:[#allocation5 + $0x38] sm:$0xff]   ;;  %s1352_s26 = scalar_lea.vmem %s1666_s23, 128  ;;  %p1785_p1 = scmp.ne.s32.totalorder %s1776_s15, 0 }
  0x61   : > { %601 = vmatprep.subr.bf16.mxu1 %v1264_v17  ;;  %v448_v59 = vld [vmem:[%s1765_s4] sm:$0x7]  ;;  %p1353_p10 = scmp.ne.s32.totalorder %s1666_s23, %s1352_s26  ;;  %s1465_s10 = smov [#allocation7]  }
  0x62   : > { %v461_v62 = vrot.slane %v448_v59, %v460_v58  ;;  %v457_v63 = vrot.slane %v448_v59, %v456_v60  ;;  %s1356_s12 = sshll.u32 %s1465_s10, 4  ;;  %s1357_s12 = int_to_ptr.vmem [resolvable:$false] %s1356_s12 }
  0x63   : > { %1158 = vmatpush3.bf16.msra.mxu0 %v1259_v13  ;;  %p1354_p2 = pnand %p1353_p10, %p1785_p1  ;;  %s1358_s13 = scalar_lea.vmem %s1357_s12, 256 }
  0x64   : > { %1159 = vmatprep.subr.bf16.mxu0 %v1462_v0  ;;  %602 = vmatpush1.bf16.msra.mxu1 %v1266_v18  ;;  %p1359_p4 = scmp.lt.s32.totalorder %s1666_s23, %s1357_s12  ;;  %p1360_p7 = scmp.lt.s32.totalorder %s1358_s13, %s1352_s26 }
  0x65   : > { %603 = vmatprep.subr.bf16.mxu1 %v1268_v20  ;;  %p1355_p3 = pneg %p1354_p2 }
  0x66   : > { %p1361_p8 = por %p1360_p7, %p1359_p4 }
  0x67   : > { %1160 = vmatpush3.bf16.msra.mxu0 %v1263_v16 }
  0x68   : > { %1161 = vmatprep.subr.bf16.mxu0 %v1462_v0  ;;  %604 = vmatpush1.bf16.msra.mxu1 %v1270_v21  ;;  %p1362_p11 = pnand %p1361_p8, %p1355_p3 }
  0x69   : > { %605 = vmatprep.subr.bf16.mxu1 %v1272_v23 }
  0x6b   : > { %1162 = vmatpush3.bf16.msra.mxu0 %v1267_v19 }
  0x6c   : > { %1163 = vmatprep.subr.bf16.mxu0 %v1462_v0  ;;  %606 = vmatpush1.bf16.msra.mxu1 %v1274_v24 }
  0x6d   : > { %607 = vmatprep.subr.bf16.mxu1 %v1276_v26 }
  0x6f   : > { %1164 = vmatpush3.bf16.msra.mxu0 %v1271_v22 }
  0x70   : > { %1165 = vmatprep.subr.bf16.mxu0 %v1462_v0  ;;  %608 = vmatpush1.bf16.msra.mxu1 %v1278_v27 }
  0x71   : > { %1125 = vmatprep.subr.bf16.mxu1 %v1280_v30 }
  0x73   : > { %1166 = vmatpush3.bf16.msra.mxu0 %v1275_v25 }
  0x74   : > { %1167 = vmatprep.subr.bf16.mxu0 %v1462_v0  ;;  %v453_v0 = vrot.slane %v448_v59, %v452_v61 }
  0x77   : > { %1168 = vmatpush3.bf16.msra.mxu0 %v1279_v28 }
 0x12d   : > { %v406_v32 = vpop.f32.mrb[0].mxu0 }
 0x12e   : > { %v407_v33 = vadd.f32 %v1042_v31, %v406_v32  ;;  %v1151_v34 = vpop.f32.mrb[1].mxu0 }
 0x12f   : > { %v409_v35 = vpop.f32.mrb[2].mxu0 }
 0x130   : > { %v410_v36 = vadd.f32 %v1042_v31, %v409_v35  ;;  %v1152_v37 = vpop.f32.mrb[3].mxu0  ;;  %v413_v38 = vmax.f32 %v407_v33, 0.0 }
 0x132   : > { %v414_v39 = vmax.f32 %v410_v36, 0.0 }
 0x134   : > { %v415_v41 = vpack.c.bf16 %v414_v39, %v413_v38 }
 0x136   : > { %626 = vmatmul.mubr.bf16.vlgmr.msra.gmra.mrb[0].mxu1 %v415_v41  ;;  %1170 = vmatmul.mubr.bf16.vlgmr.msra.gmra.mrb[4].mxu0 %v415_v41 }
 0x137   : > { %1126 = vmatpush3.bf16.msra.mxu1 %v1281_v40 }
 0x138   : > { %1127 = vmatprep.subr.bf16.mxu1 %v1282_v42 }
 0x13b   : > { %1128 = vmatpush3.bf16.msra.mxu1 %v1283_v43 }
 0x13c   : > { %1129 = vmatprep.subr.bf16.mxu1 %v1284_v44 }
 0x13f   : > { %1130 = vmatpush3.bf16.msra.mxu1 %v1285_v45 }
 0x140   : > { %1131 = vmatprep.subr.bf16.mxu1 %v1286_v46 }
 0x143   : > { %1132 = vmatpush3.bf16.msra.mxu1 %v1287_v47 }
 0x144   : > { %1133 = vmatprep.subr.bf16.mxu1 %v1288_v48 }
 0x147   : > { %1134 = vmatpush3.bf16.msra.mxu1 %v1289_v49 }
 0x148   : > { %1135 = vmatprep.subr.bf16.mxu1 %v1290_v50 }
 0x14b   : > { %1136 = vmatpush3.bf16.msra.mxu1 %v1291_v51 }
 0x14c   : > { %1137 = vmatprep.subr.bf16.mxu1 %v1292_v52 }
 0x14f   : > { %1138 = vmatpush3.bf16.msra.mxu1 %v1293_v53 }
 0x150   : > { %1139 = vmatprep.subr.bf16.mxu1 %v1294_v54 }
 0x153   : > { %1140 = vmatpush3.bf16.msra.mxu1 %v1295_v55 }
 0x209   : > { %v627_v1 = vpop.f32.mrb[0].mxu1  ;;  %v670_v2 = vpop.f32.mrb[4].mxu0 }
 0x20a   : > { %v671_v3 = vadd.f32 %v670_v2, %v461_v62  ;;  %v629_v4 = vpop.f32.mrb[1].mxu1  ;;  %v1171_v5 = vpop.f32.mrb[5].mxu0  ;;  %v628_v9 = vadd.f32 %v627_v1, %v453_v0 }
 0x20b   : > { %v630_v6 = vadd.f32 %v629_v4, %v457_v63  ;;  %v631_v7 = vpop.f32.mrb[2].mxu1  ;;  %v673_v8 = vpop.f32.mrb[6].mxu0 }
 0x20c   : > { %v632_v10 = vadd.f32 %v631_v7, %v453_v0  ;;  %v674_v11 = vadd.f32 %v673_v8, %v461_v62  ;;  %v633_v12 = vpop.f32.mrb[3].mxu1  ;;  %v1172_v13 = vpop.f32.mrb[7].mxu0  ;;  %v678_v15 = vmax.f32 %v671_v3, 0.0 }
 0x20d   : > { %v634_v14 = vadd.f32 %v633_v12, %v457_v63  ;;  %v677_v18 = vmax.f32 %v630_v6, 0.0 }
 0x20e   : > { %v1107_v16 = vpack.c.bf16 %v632_v10, %v628_v9  ;;  %v680_v17 = vmax.f32 %v674_v11, 0.0 }
 0x20f   : > { %v679_v19 = vmax.f32 %v634_v14, 0.0 }
 0x210   : > { %1108 = vst [vmem:[%s333_s21] sm:$0xff] %v1107_v16   ;;  %v682_v20 = vpack.c.bf16 %v680_v17, %v678_v15 }
 0x211   : > { %v681_v21 = vpack.c.bf16 %v679_v19, %v677_v18 }
 0x212   : > { %860 = vmatprep.mubr.bf16.mxu1 %v682_v20 }
 0x213   : > { %861 = vmatmul.mubr.bf16.vlgmr.msra.gmra.mrb[4].mxu1 %v681_v21 }
 0x214   : > { %1365 = shalt.err (!%p1362_p11)
}
 0x215   : > { %s1366_s18 = scalar_lea.hbm %s1674_s24, 128  ;;  %s1370_s17 = scalar_lea.hbm %s1768_s7, 512 }
 0x216   : > { %p1367_p13 = scmp.ne.s32.totalorder %s1674_s24, %s1366_s18  ;;  %p1371_p6 = scmp.lt.u32.totalorder %s1674_s24, %s1768_s7 }
 0x217   : > { %p1372_p9 = scmp.lt.u32.totalorder %s1370_s17, %s1366_s18  ;;  %p1374_p10 = scmp.lt.u32.totalorder %s1366_s18, %s1674_s24 }
 0x218   : > { %p1368_p0 = pnand %p1367_p13, %p1785_p1 }
 0x219   : > { %p1373_p12 = por %p1372_p9, %p1371_p6 }
 0x21a   : > { %p1369_p5 = pneg %p1368_p0 }
 0x21b   : > { %p1375_p2 = por %p1374_p10, %p1373_p12 }
 0x21d   : > { %p1376_p3 = pnand %p1375_p2, %p1369_p5 }
 0x21f   : > { %1379 = shalt.err (!%p1376_p3)
}
 0x220   : > { %s1466_s26 = smov 64   ;;  %s1467_s12 = smov 4   ;;  %v1071_v26 = vld [vmem:[%s1767_s6] ss:$0 sm:$0xff] }
 0x221   : > { %1181 = dma.vmem_to_hbm [thread:$0]  (%p1785_p1), %s1666_s23, 128, %s1674_s24, %s880_s25, %s1466_s26, %s1466_s26, %s1467_s12  }
 0x222   : > { %s340_s19 = scalar_lea.vmem [#allocation8], %s1038_s14  ;;  %s1713_s25 = scalar_lea.hbm %s1769_s8, %s1102_s20 }
 0x223   : > { %s914_s21 = sshll.u32 %s340_s19, 4  ;;  %s885_s17 = scalar_lea.sflag [#allocation9], %s1661_s29  ;;  %s1715_s21 = int_to_ptr.vmem [resolvable:$true] %s914_s21 }
 0x224   : > { %s1380_s22 = scalar_lea.vmem %s1715_s21, 128  ;;  %s1468_s14 = smov [#allocation8]  }
 0x225   : > { %p1381_p4 = scmp.ne.s32.totalorder %s1715_s21, %s1380_s22  ;;  %s1384_s10 = sshll.u32 %s1468_s14, 4  ;;  %s1385_s10 = int_to_ptr.vmem [resolvable:$false] %s1384_s10 }
 0x226   : > { %s1386_s9 = scalar_lea.vmem %s1385_s10, 256  ;;  %p1387_p11 = scmp.lt.s32.totalorder %s1715_s21, %s1385_s10 }
 0x227   : > { %p1382_p7 = pnand %p1381_p4, %p1785_p1  ;;  %p1388_p13 = scmp.lt.s32.totalorder %s1386_s9, %s1380_s22 }
 0x229   : > { %p1383_p8 = pneg %p1382_p7  ;;  %p1389_p0 = por %p1388_p13, %p1387_p11 }
 0x22b   : > { %p1390_p5 = pnand %p1389_p0, %p1383_p8 }
 0x2e6   : > { %v1141_v22 = vpop.f32.mrb[4].mxu1 }
 0x2e7   : > { %v1142_v23 = vpop.f32.mrb[5].mxu1 }
 0x2e8   : > { %v1143_v24 = vadd.f32 %v1142_v23, %v1141_v22  ;;  %v1144_v25 = vpop.f32.mrb[6].mxu1 }
 0x2e9   : > { %v1145_v27 = vpop.f32.mrb[7].mxu1 }
 0x2ea   : > { %v1146_v28 = vadd.f32 %v1145_v27, %v1144_v25  ;;  %v863_v29 = vadd.f32 %v1143_v24, %v1071_v26 }
 0x2ec   : > { %v866_v30 = vadd.f32 %v1146_v28, %v1071_v26 }
 0x2ee   : > { %v1112_v31 = vpack.c.bf16 %v866_v30, %v863_v29 }
 0x2f0   : > { %1113 = vst [vmem:[%s340_s19] sm:$0xff] %v1112_v31  }
 0x2f1   : > { %1393 = shalt.err (!%p1390_p5)
}
 0x2f2   : > { %s1394_s20 = scalar_lea.hbm %s1713_s25, 128  ;;  %s1398_s19 = scalar_lea.hbm %s1769_s8, 512 }
 0x2f3   : > { %p1395_p6 = scmp.ne.s32.totalorder %s1713_s25, %s1394_s20  ;;  %p1399_p10 = scmp.lt.u32.totalorder %s1713_s25, %s1769_s8 }
 0x2f4   : > { %p1400_p2 = scmp.lt.u32.totalorder %s1398_s19, %s1394_s20  ;;  %p1402_p4 = scmp.lt.u32.totalorder %s1394_s20, %s1713_s25 }
 0x2f5   : > { %p1396_p9 = pnand %p1395_p6, %p1785_p1 }
 0x2f6   : > { %p1401_p3 = por %p1400_p2, %p1399_p10 }
 0x2f7   : > { %p1397_p12 = pneg %p1396_p9 }
 0x2f8   : > { %p1403_p7 = por %p1402_p4, %p1401_p3 }
 0x2fa   : > { %p1404_p8 = pnand %p1403_p7, %p1397_p12 }
 0x2fc   : > { %1407 = shalt.err (!%p1404_p8)
}
 0x2fd   : > { %1182 = dma.vmem_to_hbm [thread:$0]  (%p1785_p1), %s1715_s21, 128, %s1713_s25, %s885_s17, %s1466_s26, %s1466_s26, %s1467_s12  }
 0x2fe PF: > { %p1203_p11 = scmp.ge.s32.totalorder %s1454_s30, 2  ;;  %s929_s22 = sand.u32 1, %s1442_s27  }
 0x2ff   : > { %p1786_p13 = scmp.ne.s32.totalorder %s1777_s16, 0  ;;  %s930_s14 = scalar_lea.sflag [#allocation4], %s929_s22 }
 0x301   : > { %p1193_p0 = pnand %p1203_p11, %p1786_p13 }
 0x303   : > { %1433 = dma.done.wait (!%p1193_p0), %s930_s14, 128  }
 0x304   : > { %1435 = vsyncadd (!%p1193_p0), %s930_s14, 4294967168  ;;  %s939_s15 = scalar_lea.sflag [#allocation9], %s929_s22 }
 0x305   : > { %1437 = dma.done.wait (!%p1193_p0), %s939_s15, 128  }
 0x306   : > { %1439 = vsyncadd (!%p1193_p0), %s939_s15, 4294967168  ;;  %s1787_s29 = sld [smem:[#allocation14_spill]]  ;;  %s1788_s10 = sld [smem:[#allocation15_spill]] }
 0x307   : > { %p24_p1 = scmp.ge.s32.totalorder %s1539_s11, 6   ;;  %s1789_s27 = smov %s1446_s28 }
 0x308   : > { %s1792_s30 = smov %s1539_s11 }
 0x309   :  { %26 = sbr.rel (!%p24_p1) target bundleno = 7 (0x7), region = 109 }
 0x30c   : > { %s1790_s28 = smov %s1787_s29  ;;  %s1791_s29 = smov %s1788_s10 }
 0x310   :  { %944 = vsyncpa [#allocation3], 1 }
 0x311   :  { %946 = vsyncpa [#allocation3 + $0x1], 1 }
 0x312   :  { %947 = vsyncpa [#allocation6], 1 }
 0x313   :  { %948 = vsyncpa [#allocation4], 1 }
 0x314   :  { %950 = vsyncpa [#allocation4 + $0x1], 1 }
 0x315   :  { %951 = vsyncpa [#allocation9], 1 }
 0x316   :  { %953 = vsyncpa [#allocation9 + $0x1], 1 }

</bundles_post_ra>
